<compile_context>
chip_gen: v5e
topology: v5e:2x2
jax: 0.10.0
libtpu: 0.0.40
codegen_flags: <defaults>
</compile_context>

<pallas_src>
import jax
import jax.numpy as jnp
from jax.experimental import pallas as pl
from jax.experimental.pallas import tpu as pltpu


# --------------------------------------------------------------------------- #
# Kernels
# --------------------------------------------------------------------------- #
def _dequant_kernel(w_ref, s_ref, o_ref):
    # w_ref: (TO, TI) int8, s_ref: (TO, 1) float, o_ref: (TO, TI) result_dtype
    # Matches torch: weight.to(result_dtype).mul_(scale) (multiply in result dtype).
    w = w_ref[...].astype(o_ref.dtype)
    s = s_ref[...].astype(o_ref.dtype)
    o_ref[...] = w * s


def _dequant_kernel_transposed(w_ref, s_ref, o_ref):
    # w_ref: (TI, TO) int8 (quantized-matmul storage is transposed),
    # s_ref: (TO, 1) float, o_ref: (TO, TI) result_dtype.
    # Cast int8 -> f32 (exact), transpose the tile on the XLU, downcast (exact
    # for int8 range), then scale -> identical numerics to the direct path,
    # without ever materializing a transposed int8 copy in HBM.
    w = jnp.transpose(w_ref[...].astype(jnp.float32)).astype(o_ref.dtype)
    s = s_ref[...].astype(o_ref.dtype)
    o_ref[...] = w * s


# --------------------------------------------------------------------------- #
# Wrapper
# --------------------------------------------------------------------------- #
def dequantize_symmetric(
    weight: jax.Array,          # int8, (O, I) -- or (I, O) if skip_quantized_matmul
    scale: jax.Array,           # float, (O, 1)
    result_dtype,
    result_shape,
    skip_quantized_matmul: bool = False,
    *,
    tile_o: int = 512,          # multiple of 128 (lane axis in the transposed path)
    tile_i: int = 2048,         # multiple of 128 (lane axis of the output)
    tile_i_transposed: int = 1024,  # smaller: f32 transpose temporaries live in VMEM
):
    O = scale.shape[0]
    assert scale.shape == (O, 1), scale.shape

    if skip_quantized_matmul:
        I, O_w = weight.shape
    else:
        O_w, I = weight.shape
    assert O_w == O, (weight.shape, scale.shape)

    # Clamp block edges to the full array dims when the array is small; otherwise
    # the defaults (multiples of 8/128) satisfy the TPU tiling constraints and
    # ragged boundary blocks are masked automatically.
    to = O if O <= tile_o else tile_o
    ti_req = tile_i_transposed if skip_quantized_matmul else tile_i
    ti = I if I <= ti_req else ti_req

    grid = (pl.cdiv(O, to), pl.cdiv(I, ti))

    if skip_quantized_matmul:
        kernel = _dequant_kernel_transposed
        # Read the stored (I, O) layout directly: block (ti, to) at block index (j, i).
        w_spec = pl.BlockSpec((ti, to), lambda i, j: (j, i))
    else:
        kernel = _dequant_kernel
        w_spec = pl.BlockSpec((to, ti), lambda i, j: (i, j))

    out2d = pl.pallas_call(
        kernel,
        out_shape=jax.ShapeDtypeStruct((O, I), result_dtype),
        grid_spec=pltpu.PrefetchScalarGridSpec(
            num_scalar_prefetch=0,
            grid=grid,
            in_specs=[
                w_spec,
                # Scale block index is constant over the inner j axis -> not re-DMA'd.
                pl.BlockSpec((to, 1), lambda i, j: (i, 0)),
            ],
            out_specs=pl.BlockSpec((to, ti), lambda i, j: (i, j)),
        ),
        compiler_params=pltpu.CompilerParams(
            dimension_semantics=("parallel", "parallel"),
            vmem_limit_bytes=32 * 1024 * 1024,
        ),
    )(weight, scale)

    # NOTE: free only when result_shape is a row-major refactoring of (O, I).
    return out2d.reshape(result_shape)


class SymmetricWeightsDequantizer:
    """JAX/Pallas port of the SDNQ SymmetricWeightsDequantizer module."""

    def __init__(self, scale, result_dtype, result_shape, original_shape,
                 weights_dtype: str, use_quantized_matmul: bool = False, **kwargs):
        self.weights_dtype = weights_dtype
        self.original_shape = original_shape
        self.use_quantized_matmul = use_quantized_matmul
        self.result_dtype = result_dtype
        self.result_shape = result_shape
        self.scale = scale  # registered buffer

    def pack_weight(self, weight):
        # weights_dtype == "int8" -> int8 storage
        return weight.astype(jnp.int8)

    def __call__(self, weight, skip_quantized_matmul: bool = False, **kwargs):
        return dequantize_symmetric(
            weight,
            self.scale,
            self.result_dtype,
            self.result_shape,
            skip_quantized_matmul=skip_quantized_matmul,
        )


# --------------------------------------------------------------------------- #
# Self-test
# --------------------------------------------------------------------------- #
if __name__ == "__main__":
    key = jax.random.PRNGKey(0)
    k_w, k_s, k_w2, k_s2 = jax.random.split(key, 4)

    # ---- Small, deterministic synthetic quantized linear weight -------------
    O, I = 64, 256                      # out_features, in_features
    result_dtype = jnp.bfloat16
    original_shape = (O, I)
    result_shape = (O, 8, 4, 8)         # 8*4*8 == 256, exercises the reshape

    weight_q = jax.random.randint(k_w, (O, I), -127, 128, dtype=jnp.int32).astype(jnp.int8)
    scale = (jax.random.uniform(k_s, (O, 1), jnp.float32) * 0.05 + 0.001)

    deq = SymmetricWeightsDequantizer(
        scale=scale,
        result_dtype=result_dtype,
        result_shape=result_shape,
        original_shape=original_shape,
        weights_dtype="int8",
        use_quantized_matmul=False,
    )

    out = jax.block_until_ready(deq(weight_q, skip_quantized_matmul=False))

    # Reference in plain JAX (same math as torch: cast then multiply).
    ref = (weight_q.astype(result_dtype) * scale.astype(result_dtype)).reshape(result_shape)
    assert out.shape == tuple(result_shape), (out.shape, result_shape)
    assert out.dtype == result_dtype
    assert jnp.allclose(out.astype(jnp.float32), ref.astype(jnp.float32), atol=1e-2, rtol=1e-2)

    # ---- skip_quantized_matmul (transposed storage) path ---------------------
    weight_q_t = weight_q.T  # stored (I, O); the kernel reads it without an HBM transpose
    out_t = jax.block_until_ready(deq(weight_q_t, skip_quantized_matmul=True))
    assert jnp.allclose(out_t.astype(jnp.float32), ref.astype(jnp.float32), atol=1e-2, rtol=1e-2)

    # ---- Multi-block grid + ragged (masked) boundary blocks ------------------
    O2, I2 = 40, 384
    weight2 = jax.random.randint(k_w2, (O2, I2), -127, 128, dtype=jnp.int32).astype(jnp.int8)
    scale2 = (jax.random.uniform(k_s2, (O2, 1), jnp.float32) * 0.05 + 0.001)
    ref2 = weight2.astype(result_dtype) * scale2.astype(result_dtype)

    # Direct path: grid (cdiv(40,16)=3, cdiv(384,128)=3), last O block masked.
    out2 = jax.block_until_ready(
        dequantize_symmetric(weight2, scale2, result_dtype, (O2, I2),
                             skip_quantized_matmul=False, tile_o=16, tile_i=128))
    assert jnp.allclose(out2.astype(jnp.float32), ref2.astype(jnp.float32), atol=1e-2, rtol=1e-2)

    # Transposed-storage path: grid (1, cdiv(384,256)=2), last I block masked.
    out2_t = jax.block_until_ready(
        dequantize_symmetric(weight2.T, scale2, result_dtype, (O2, I2),
                             skip_quantized_matmul=True, tile_i_transposed=256))
    assert jnp.allclose(out2_t.astype(jnp.float32), ref2.astype(jnp.float32), atol=1e-2, rtol=1e-2)

    print("KERNEL_OK")
</pallas_src>

<mosaic_0001>
module attributes {stable_mosaic.version = 11 : i64} {
  func.func @_dequant_kernel(%arg0: i32, %arg1: i32, %arg2: memref<64x256xi8, #tpu.memory_space<vmem>>, %arg3: memref<64x1xf32, #tpu.memory_space<vmem>>, %arg4: memref<64x256xbf16, #tpu.memory_space<vmem>>) attributes {dimension_semantics = [#tpu.dimension_semantics<parallel>, #tpu.dimension_semantics<parallel>], iteration_bounds = array<i64: 1, 1>, scalar_prefetch = 0 : i64, scratch_operands = 0 : i64, tpu.core_type = #tpu.core_type<tc>, window_params = [{transform_indices = @transform_0, window_bounds = array<i64: 64, 256>}, {transform_indices = @transform_1, window_bounds = array<i64: 64, 1>}, {transform_indices = @transform_2, window_bounds = array<i64: 64, 256>}]} {
    %c0 = arith.constant 0 : index
    %c0_0 = arith.constant 0 : index
    %0 = vector.load %arg2[%c0, %c0_0] : memref<64x256xi8, #tpu.memory_space<vmem>>, vector<64x256xi8>
    %1 = arith.sitofp %0 : vector<64x256xi8> to vector<64x256xbf16>
    %c0_1 = arith.constant 0 : index
    %c0_2 = arith.constant 0 : index
    %2 = vector.load %arg3[%c0_1, %c0_2] : memref<64x1xf32, #tpu.memory_space<vmem>>, vector<64x1xf32>
    %3 = arith.truncf %2 : vector<64x1xf32> to vector<64x1xbf16>
    %4 = vector.broadcast %3 : vector<64x1xbf16> to vector<64x256xbf16>
    %5 = arith.mulf %1, %4 : vector<64x256xbf16>
    %c0_3 = arith.constant 0 : index
    %c0_4 = arith.constant 0 : index
    %6 = vector.load %arg4[%c0_3, %c0_4] : memref<64x256xbf16, #tpu.memory_space<vmem>>, vector<64x256xbf16>
    tpu.vector_store %arg4[%c0_3, %c0_4], %5 {strides = array<i32>} : memref<64x256xbf16, #tpu.memory_space<vmem>>, vector<64x256xbf16>,
    return
  }
  func.func @transform_0(%arg0: i32, %arg1: i32) -> (i32, i32) {
    %c0_i32 = arith.constant 0 : i32
    return %arg0, %arg1 : i32, i32
  }
  func.func @transform_1(%arg0: i32, %arg1: i32) -> (i32, i32) {
    %c0_i32 = arith.constant 0 : i32
    %c0_i32_0 = arith.constant 0 : i32
    return %arg0, %c0_i32 : i32, i32
  }
  func.func @transform_2(%arg0: i32, %arg1: i32) -> (i32, i32) {
    %c0_i32 = arith.constant 0 : i32
    return %arg0, %arg1 : i32, i32
  }
}

</mosaic_0001>

<bundles_post_ra>
// kernel: tpu_custom_call.1
= control target key start
LH: loop header
LB: loop body
LE: loop exit
PB: predicated region body
PF: predicated region fallthrough
CT: control target
= control target key end

     0   :  { %v252_v2 = vmov 0   ;;  %s333_s0 = inlined_call_operand.vmem [shape: s8[64,256], index: 0, kind: input, shape index: {}]   ;;  %s334_s1 = inlined_call_operand.vmem [shape: f32[64,1], index: 1, kind: input, shape index: {}]   ;;  %s335_s2 = inlined_call_operand.hbm [shape: bf16[64,256], index: 2, kind: output, shape index: {}]  }
   0x1   :  { %v58_v0 = vld [vmem:[%s334_s1 + $0x10] sm:$0xff]  ;;  %v56_v1 = vld [vmem:[%s334_s1] sm:$0xff]  ;;  %224 = vset.pattern.permute.xlu1 %v252_v2  ;;  %223 = vset.pattern.permute.xlu0 %v252_v2 }
   0x2   :  { %v66_v3 = vpack.c.bf16 %v58_v0, %v58_v0  ;;  %v64_v4 = vpack.c.bf16 %v56_v1, %v56_v1  ;;  %225 = vset.pattern.permute.xlu2 %v252_v2  ;;  %v60_v5 = vld [vmem:[%s334_s1 + $0x20] sm:$0xff] }
   0x3   :  { %7 = vsyncpa [#allocation3], 0  ;;  %v68_v6 = vpack.c.bf16 %v60_v5, %v60_v5  ;;  %v59_v7 = vld [vmem:[%s334_s1 + $0x18] sm:$0xff]  ;;  %v57_v8 = vld [vmem:[%s334_s1 + $0x8] sm:$0xff]  ;;  %v253_v23 = vmov 839922192  }
   0x4   :  { %92 = vperm.xlu1 %224, %v66_v3   ;;  %74 = vperm.xlu0 %223, %v64_v4   ;;  %v61_v9 = vld [vmem:[%s334_s1 + $0x28] sm:$0xff]  ;;  %v67_v10 = vpack.c.bf16 %v59_v7, %v59_v7  ;;  %v65_v11 = vpack.c.bf16 %v57_v8, %v57_v8  ;;  %v63_v13 = vld [vmem:[%s334_s1 + $0x38] sm:$0xff]  ;;  %v62_v14 = vld [vmem:[%s334_s1 + $0x30] sm:$0xff]  ;;  %v78_v24 = vunpack.c.l.s4 %v253_v23  ;;  %s206_s7 = sshll.u32 %s335_s2, 4  ;;  %s255_s8 = smov 128   ;;  %s207_s7 = int_to_ptr.hbm [resolvable:$true] %s206_s7 }
   0x5   :  { %110 = vperm.xlu2 %225, %v68_v6   ;;  %v69_v12 = vpack.c.bf16 %v61_v9, %v61_v9  ;;  %v71_v15 = vpack.c.bf16 %v63_v13, %v63_v13  ;;  %v70_v16 = vpack.c.bf16 %v62_v14, %v62_v14  ;;  %v299_v17 = vld [vmem:[%s333_s0 + $0x10] sm:$0xff]  ;;  %v304_v18 = vld [vmem:[%s333_s0 + $0x18] sm:$0xff]  ;;  %v12_v40 = vld [vmem:[%s333_s0] sm:$0xff]  ;;  %s256_s9 = smov 8  }
   0x6   :  { %v24_v19 = vunpack.c.0.s8 %v299_v17  ;;  %v25_v20 = vunpack.c.0.s8 %v304_v18  ;;  %v26_v26 = vunpack.c.1.s8 %v299_v17  ;;  %v27_v27 = vunpack.c.1.s8 %v304_v18  ;;  %v13_v41 = vld [vmem:[%s333_s0 + $0x8] sm:$0xff]  ;;  %s254_s0 = smov [#allocation2]  }
   0x7   :  { %v310_v28 = vunpack.c.0.s8 %v78_v24  ;;  %v20_v46 = vunpack.c.2.s8 %v12_v40  ;;  %v21_v47 = vunpack.c.2.s8 %v13_v41  ;;  %v16_v48 = vunpack.c.0.s8 %v12_v40  ;;  %s204_s4 = sshll.u32 %s254_s0, 4  ;;  %s205_s4 = int_to_ptr.vmem [resolvable:$true] %s204_s4 }
   0x8   :  { %v40_v21 = vcvt.s32.f32 %v24_v19  ;;  %v41_v22 = vcvt.s32.f32 %v25_v20  ;;  %v42_v33 = vcvt.s32.f32 %v26_v26  ;;  %v43_v34 = vcvt.s32.f32 %v27_v27 }
   0x9   :  { %v17_v49 = vunpack.c.0.s8 %v13_v41  ;;  %v36_v53 = vcvt.s32.f32 %v20_v46  ;;  %v37_v54 = vcvt.s32.f32 %v21_v47  ;;  %v32_v55 = vcvt.s32.f32 %v16_v48 }
   0xa   :  { %v52_v25 = vpack.c.bf16 %v41_v22, %v40_v21  ;;  %v53_v38 = vpack.c.bf16 %v43_v34, %v42_v33  ;;  %v22_v58 = vunpack.c.3.s8 %v12_v40  ;;  %v23_v59 = vunpack.c.3.s8 %v13_v41 }
   0xb   :  { %v33_v56 = vcvt.s32.f32 %v17_v49  ;;  %v18_v60 = vunpack.c.1.s8 %v12_v40  ;;  %v19_v61 = vunpack.c.1.s8 %v13_v41  ;;  %v50_v62 = vpack.c.bf16 %v37_v54, %v36_v53 }
   0xc   :  { %101 = vperm.xlu1 %224, %v67_v10   ;;  %83 = vperm.xlu0 %223, %v65_v11   ;;  %v152_v30 = vunpack.c.l.bf16 %v52_v25  ;;  %v153_v32 = vunpack.c.h.bf16 %v52_v25  ;;  %v154_v44 = vunpack.c.l.bf16 %v53_v38  ;;  %v155_v45 = vunpack.c.h.bf16 %v53_v38 }
   0xd   :  { %119 = vperm.xlu2 %225, %v69_v12   ;;  %v48_v63 = vpack.c.bf16 %v33_v56, %v32_v55  ;;  %v38_v0 = vcvt.s32.f32 %v22_v58  ;;  %v39_v1 = vcvt.s32.f32 %v23_v59  ;;  %v34_v2 = vcvt.s32.f32 %v18_v60 }
   0xe   :  { %v35_v3 = vcvt.s32.f32 %v19_v61  ;;  %v148_v5 = vunpack.c.l.bf16 %v50_v62  ;;  %v149_v6 = vunpack.c.h.bf16 %v50_v62  ;;  %v31_v19 = vunpack.c.3.s8 %v304_v18 }
   0xf   :  { %v144_v10 = vunpack.c.l.bf16 %v48_v63  ;;  %v145_v11 = vunpack.c.h.bf16 %v48_v63  ;;  %v51_v14 = vpack.c.bf16 %v39_v1, %v38_v0  ;;  %v28_v20 = vunpack.c.2.s8 %v299_v17 }
  0x10   :  { %v29_v21 = vunpack.c.2.s8 %v304_v18  ;;  %v47_v34 = vcvt.s32.f32 %v31_v19 }
  0x14   :  { %137 = vperm.xlu1 %224, %v71_v15   ;;  %128 = vperm.xlu0 %223, %v70_v16   ;;  %v49_v15 = vpack.c.bf16 %v35_v3, %v34_v2  ;;  %v30_v16 = vunpack.c.3.s8 %v299_v17 }
  0x16   :  { %v46_v33 = vcvt.s32.f32 %v30_v16  ;;  %v146_v18 = vunpack.c.l.bf16 %v49_v15  ;;  %v147_v38 = vunpack.c.h.bf16 %v49_v15 }
  0x18   :  { %v55_v41 = vpack.c.bf16 %v47_v34, %v46_v33 }
  0x5f   :  { %v111_v29 = vpop.permute.xlu2 %110 }
  0x60   :  { %v116_v31 = vperm.slane %v111_v29, %v310_v28  ;;  %v150_v29 = vunpack.c.l.bf16 %v51_v14 }
  0x62   :  { %v164_v35 = vunpack.c.l.bf16 %v116_v31 }
  0x64   :  { %v176_v36 = vmul.f32 %v164_v35, %v152_v30  ;;  %v177_v37 = vmul.f32 %v164_v35, %v153_v32  ;;  %v151_v30 = vunpack.c.h.bf16 %v51_v14  ;;  %v44_v35 = vcvt.s32.f32 %v28_v20 }
  0x66   :  { %v188_v39 = vpack.c.bf16 %v177_v37, %v176_v36  ;;  %v45_v36 = vcvt.s32.f32 %v29_v21 }
  0x67   :  { %v120_v42 = vpop.permute.xlu2 %119 }
  0x68   :  { %196 = vst [vmem:[#allocation2 + $0x20] sm:$0xff] %v188_v39  ;;  %v125_v43 = vperm.slane %v120_v42, %v310_v28  ;;  %v54_v42 = vpack.c.bf16 %v45_v36, %v44_v35 }
  0x6a   :  { %v165_v50 = vunpack.c.l.bf16 %v125_v43  ;;  %v156_v55 = vunpack.c.l.bf16 %v54_v42  ;;  %v157_v56 = vunpack.c.h.bf16 %v54_v42 }
  0x6c   :  { %v178_v51 = vmul.f32 %v165_v50, %v154_v44  ;;  %v179_v52 = vmul.f32 %v165_v50, %v155_v45  ;;  %v158_v50 = vunpack.c.l.bf16 %v55_v41 }
  0x6e   :  { %v189_v57 = vpack.c.bf16 %v179_v52, %v178_v51  ;;  %v159_v51 = vunpack.c.h.bf16 %v55_v41 }
  0x70   :  { %197 = vst [vmem:[#allocation2 + $0x28] sm:$0xff] %v189_v57 }
  0x76   :  { %v93_v4 = vpop.permute.xlu1 %92  ;;  %v75_v7 = vpop.permute.xlu0 %74 }
  0x77   :  { %v98_v8 = vperm.slane %v93_v4, %v310_v28  ;;  %v80_v9 = vperm.slane %v75_v7, %v310_v28 }
  0x79   :  { %v162_v12 = vunpack.c.l.bf16 %v98_v8  ;;  %v160_v13 = vunpack.c.l.bf16 %v80_v9 }
  0x7b   :  { %v172_v22 = vmul.f32 %v162_v12, %v148_v5  ;;  %v173_v23 = vmul.f32 %v162_v12, %v149_v6  ;;  %v168_v24 = vmul.f32 %v160_v13, %v144_v10  ;;  %v169_v25 = vmul.f32 %v160_v13, %v145_v11 }
  0x7d   :  { %v186_v26 = vpack.c.bf16 %v173_v23, %v172_v22  ;;  %v184_v27 = vpack.c.bf16 %v169_v25, %v168_v24 }
  0x7e   :  { %v102_v31 = vpop.permute.xlu1 %101  ;;  %v84_v32 = vpop.permute.xlu0 %83 }
  0x7f   :  { %194 = vst [vmem:[#allocation2 + $0x10] sm:$0xff] %v186_v26  ;;  %v107_v37 = vperm.slane %v102_v31, %v310_v28  ;;  %v89_v17 = vperm.slane %v84_v32, %v310_v28 }
  0x80   :  { %192 = vst [vmem:[#allocation2] sm:$0xff] %v184_v27 }
  0x81   :  { %v163_v39 = vunpack.c.l.bf16 %v107_v37  ;;  %v161_v40 = vunpack.c.l.bf16 %v89_v17 }
  0x83   :  { %v174_v43 = vmul.f32 %v163_v39, %v150_v29  ;;  %v175_v44 = vmul.f32 %v163_v39, %v151_v30  ;;  %v170_v45 = vmul.f32 %v161_v40, %v146_v18  ;;  %v171_v46 = vmul.f32 %v161_v40, %v147_v38 }
  0x85   :  { %v187_v47 = vpack.c.bf16 %v175_v44, %v174_v43  ;;  %v185_v48 = vpack.c.bf16 %v171_v46, %v170_v45 }
  0x86   :  { %v138_v49 = vpop.permute.xlu1 %137  ;;  %v129_v52 = vpop.permute.xlu0 %128 }
  0x87   :  { %195 = vst [vmem:[#allocation2 + $0x18] sm:$0xff] %v187_v47  ;;  %v143_v53 = vperm.slane %v138_v49, %v310_v28  ;;  %v134_v54 = vperm.slane %v129_v52, %v310_v28 }
  0x88   :  { %193 = vst [vmem:[#allocation2 + $0x8] sm:$0xff] %v185_v48 }
  0x89   :  { %v167_v57 = vunpack.c.l.bf16 %v143_v53  ;;  %v166_v58 = vunpack.c.l.bf16 %v134_v54 }
  0x8b   :  { %v182_v59 = vmul.f32 %v167_v57, %v158_v50  ;;  %v183_v60 = vmul.f32 %v167_v57, %v159_v51  ;;  %v180_v61 = vmul.f32 %v166_v58, %v156_v55  ;;  %v181_v62 = vmul.f32 %v166_v58, %v157_v56 }
  0x8d   :  { %v191_v63 = vpack.c.bf16 %v183_v60, %v182_v59  ;;  %v190_v0 = vpack.c.bf16 %v181_v62, %v180_v61 }
  0x8f   :  { %199 = vst [vmem:[#allocation2 + $0x38] sm:$0xff] %v191_v63 }
  0x90   :  { %198 = vst [vmem:[#allocation2 + $0x30] sm:$0xff] %v190_v0 }
  0x91   :  { %212 = dma.vmem_to_hbm [thread:$0]  %s205_s4, 1024, %s207_s7, [#allocation3], %s255_s8, %s255_s8, %s256_s9  }
  0x92   :  { %250 = dma.done.wait [#allocation3], 1024  }
  0x93   :  { %251 = vsyncadd [#allocation3], 4294966272 }
  0x94   :  { %217 = vsyncpa [#allocation3], 1 }

</bundles_post_ra>
